<compile_context>
chip_gen: v5e
topology: v5e:2x2
jax: 0.10.0
libtpu: 0.0.40
codegen_flags: <defaults>
</compile_context>

<pallas_src>
import math
import functools

import jax
import jax.numpy as jnp
from jax.experimental import pallas as pl
from jax.experimental.pallas import tpu as pltpu
import numpy as np


# ----------------------------------------------------------------------------
# PE buffer construction (matches the PyTorch __init__ exactly)
# ----------------------------------------------------------------------------
def make_pe_table(d_model: int, max_len: int = 5000) -> jnp.ndarray:
    position = jnp.arange(0.0, max_len, dtype=jnp.float32)[:, None]        # (max_len, 1)
    div_term = jnp.exp(
        jnp.arange(0.0, d_model, 2, dtype=jnp.float32)
        * -(math.log(10000.0) / d_model)
    )                                                                        # (d_model/2,)
    pe = jnp.zeros((max_len, d_model), dtype=jnp.float32)
    pe = pe.at[:, 0::2].set(jnp.sin(position * div_term))
    pe = pe.at[:, 1::2].set(jnp.cos(position * div_term))
    return pe[None, :, :]                                                    # (1, max_len, d_model)


# ----------------------------------------------------------------------------
# Counter-based hash PRNG (lowbias32 mixer) -- pure uint32 jnp ops, so it
# lowers on TPU (Mosaic) and in interpret mode alike.
# ----------------------------------------------------------------------------
def _hash_u32(x):
    x = x.astype(jnp.uint32)
    x = x ^ (x >> 16)
    x = x * jnp.uint32(0x7FEB352D)
    x = x ^ (x >> 15)
    x = x * jnp.uint32(0x846CA68B)
    x = x ^ (x >> 16)
    return x


def _dropout_threshold(dropout_p: float) -> jnp.uint32:
    # int(p * 2^32) truncation biases keep-prob by <= 2^-32 (negligible).
    return jnp.uint32(min(int(dropout_p * 4294967296.0), 4294967295))


# ----------------------------------------------------------------------------
# Pallas kernels
# ----------------------------------------------------------------------------
def pe_add_kernel(x_ref, pe_ref, o_ref):
    # eval-mode forward: out = x + pe  (dropout is identity in eval).
    # pe block has a size-1 leading dim and broadcasts over the batch dim.
    o_ref[...] = (x_ref[...] + pe_ref[...]).astype(o_ref.dtype)


def pe_add_dropout_3d_kernel(seed_ref, x_ref, pe_ref, o_ref, *,
                             dropout_p, seq_len, d_model, tile_s, batch_folded):
    # training-mode forward on (bb, tile_s, D) blocks.
    y = x_ref[...] + pe_ref[...]
    bb, ts, dd = x_ref.shape

    s0 = (pl.program_id(0) * tile_s).astype(jnp.uint32)
    if batch_folded:
        b0 = jnp.uint32(0)
    else:
        b0 = pl.program_id(1).astype(jnp.uint32)

    shape = (bb, ts, dd)
    b_idx = jax.lax.broadcasted_iota(jnp.int32, shape, 0).astype(jnp.uint32) + b0
    s_idx = jax.lax.broadcasted_iota(jnp.int32, shape, 1).astype(jnp.uint32) + s0
    d_idx = jax.lax.broadcasted_iota(jnp.int32, shape, 2).astype(jnp.uint32)
    # Global element index in the logical (B, S, D) tensor -> mask is
    # independent of the tiling choice (wraps mod 2^32 for >4G-element tensors).
    gidx = (b_idx * jnp.uint32((seq_len * d_model) & 0xFFFFFFFF)
            + s_idx * jnp.uint32(d_model & 0xFFFFFFFF)
            + d_idx)
    seed_mix = _hash_u32(seed_ref[0].astype(jnp.uint32) + jnp.uint32(0x9E3779B9))
    bits = _hash_u32(gidx ^ seed_mix)

    scale = 1.0 / (1.0 - dropout_p)
    # Fused mask + scale: one select, no mask-cast / extra multiplies.
    o_ref[...] = jnp.where(bits >= _dropout_threshold(dropout_p),
                           y * scale, 0.0).astype(o_ref.dtype)


def pe_add_dropout_flat_kernel(seed_ref, x_ref, pe_ref, o_ref, *,
                               dropout_p, flat_len, tile_len):
    # training-mode forward on lane-dense (B, tile_len) blocks of the
    # flattened (B, S*D) view.
    y = x_ref[...] + pe_ref[...]
    bb, tl = x_ref.shape

    c0 = (pl.program_id(0) * tile_len).astype(jnp.uint32)
    shape = (bb, tl)
    b_idx = jax.lax.broadcasted_iota(jnp.int32, shape, 0).astype(jnp.uint32)
    c_idx = jax.lax.broadcasted_iota(jnp.int32, shape, 1).astype(jnp.uint32) + c0
    gidx = b_idx * jnp.uint32(flat_len & 0xFFFFFFFF) + c_idx
    seed_mix = _hash_u32(seed_ref[0].astype(jnp.uint32) + jnp.uint32(0x9E3779B9))
    bits = _hash_u32(gidx ^ seed_mix)

    scale = 1.0 / (1.0 - dropout_p)
    o_ref[...] = jnp.where(bits >= _dropout_threshold(dropout_p),
                           y * scale, 0.0).astype(o_ref.dtype)


# ----------------------------------------------------------------------------
# Tiling helpers
# ----------------------------------------------------------------------------
def _pick_tile(n, unit, bytes_per_row, target_bytes):
    """Largest multiple of `unit` (<= n) whose block fits in target_bytes.

    If n < unit, return n (a full-extent block is always a legal tile).
    Ragged tails (n % tile != 0) are handled by Pallas masking.
    """
    if n <= unit:
        return n
    max_units = max(1, int(target_bytes) // max(1, unit * bytes_per_row))
    tile = min(max_units, n // unit) * unit
    return max(unit, tile)


# ----------------------------------------------------------------------------
# Wrapper
# ----------------------------------------------------------------------------
def positional_encoding_forward(x, pe_table, *, dropout_p=0.1, training=False,
                                seed=0, target_block_bytes=4 * 1024 * 1024,
                                donate_x=False):
    """x: (B, S, D).  pe_table: (1, max_len, D) float32 buffer."""
    B, S, D = x.shape
    assert pe_table.ndim == 3 and pe_table.shape[0] == 1
    assert pe_table.shape[1] >= S and pe_table.shape[2] == D

    apply_dropout = bool(training) and dropout_p > 0.0
    if apply_dropout and dropout_p >= 1.0:
        # Degenerate p=1: everything dropped (avoids uint32 threshold wrap).
        return jnp.zeros_like(x)

    # Slice PE to the used rows and cast to the activation dtype so bf16
    # inputs move bf16 PE bytes (deviation from torch's f32 promotion).
    pe = pe_table[:, :S, :].astype(x.dtype)
    itemsize = jnp.dtype(x.dtype).itemsize

    lane_dense = (D % 128 == 0)
    # Can all B batch rows of an 8-deep seq tile share one block?
    fold_ok = B * 8 * D * itemsize <= target_block_bytes
    use_flat = (not lane_dense) and (fold_ok or B == 1)

    if use_flat:
        # Lane-dense flattened layout: avoids masked vst.msk stores when
        # d_model is not a multiple of 128 (elementwise op -> pure plumbing).
        flat_len = S * D
        x_in = x.reshape(B, flat_len)
        pe_in = pe.reshape(1, flat_len)
        tile_len = _pick_tile(flat_len, 8 * 128, B * itemsize, target_block_bytes)
        grid = (pl.cdiv(flat_len, tile_len),)
        x_spec = pl.BlockSpec((B, tile_len), lambda t, *_: (0, t))
        pe_spec = pl.BlockSpec((1, tile_len), lambda t, *_: (0, t))
        out_spec = pl.BlockSpec((B, tile_len), lambda t, *_: (0, t))
        out_shape = jax.ShapeDtypeStruct((B, flat_len), x.dtype)
        x_block_bytes = B * tile_len * itemsize
        pe_block_bytes = tile_len * itemsize
        if apply_dropout:
            kernel = functools.partial(pe_add_dropout_flat_kernel,
                                       dropout_p=float(dropout_p),
                                       flat_len=flat_len, tile_len=tile_len)
        else:
            kernel = pe_add_kernel
        def reshape_out(o):
            return o.reshape(B, S, D)
    else:
        # 3-D layout.  Fold the batch into the block when it fits and still
        # leaves >= 2 grid steps (so both v7x TensorCores get work).
        fold_batch = fold_ok
        if fold_batch:
            tile_s = _pick_tile(S, 8, B * D * itemsize, target_block_bytes)
            if pl.cdiv(S, tile_s) < 2 and B >= 2:
                fold_batch = False
        if not fold_batch:
            tile_s = _pick_tile(S, 8, D * itemsize, target_block_bytes)
        n_s = pl.cdiv(S, tile_s)

        if fold_batch:
            grid = (n_s,)
            x_spec = pl.BlockSpec((B, tile_s, D), lambda s, *_: (0, s, 0))
            out_spec = pl.BlockSpec((B, tile_s, D), lambda s, *_: (0, s, 0))
            pe_spec = pl.BlockSpec((1, tile_s, D), lambda s, *_: (0, s, 0))
            x_block_bytes = B * tile_s * D * itemsize
        else:
            # Seq tiles on the OUTER axis, batch inner: the PE block index is
            # constant across the inner loop, so its DMA is reused.
            grid = (n_s, B)
            x_spec = pl.BlockSpec((1, tile_s, D), lambda s, b, *_: (b, s, 0))
            out_spec = pl.BlockSpec((1, tile_s, D), lambda s, b, *_: (b, s, 0))
            pe_spec = pl.BlockSpec((1, tile_s, D), lambda s, b, *_: (0, s, 0))
            x_block_bytes = tile_s * D * itemsize
        pe_block_bytes = tile_s * D * itemsize
        out_shape = jax.ShapeDtypeStruct((B, S, D), x.dtype)
        x_in, pe_in = x, pe
        if apply_dropout:
            kernel = functools.partial(pe_add_dropout_3d_kernel,
                                       dropout_p=float(dropout_p),
                                       seq_len=S, d_model=D, tile_s=tile_s,
                                       batch_folded=fold_batch)
        else:
            kernel = pe_add_kernel
        def reshape_out(o):
            return o
        # TODO(synk): lane-dense flatten for d_model % 128 != 0 when the batch
        # is too large to fold (currently falls back to masked stores).

    # Explicit VMEM budget: x + out + pe blocks, double-buffered, +50% slack.
    # Clamped so it is safe on v5e (16 MiB scoped default) and v7x (64 MiB
    # physical VMEM, 32 MiB scoped default).
    vmem_needed = 2 * (2 * x_block_bytes + pe_block_bytes)
    vmem_limit = int(min(max(vmem_needed * 3 // 2, 16 * 1024 * 1024),
                         48 * 1024 * 1024))
    cparams = pltpu.CompilerParams(
        dimension_semantics=("parallel",) * len(grid),
        vmem_limit_bytes=vmem_limit)

    if apply_dropout:
        seed_arr = jnp.array([seed], dtype=jnp.int32)
        io_alias = {1: 0} if donate_x else {}   # seed is arg 0, x is arg 1
        out = pl.pallas_call(
            kernel,
            out_shape=out_shape,
            grid_spec=pltpu.PrefetchScalarGridSpec(
                num_scalar_prefetch=1,           # seed scalar lands in SMEM
                grid=grid,
                in_specs=[x_spec, pe_spec],
                out_specs=out_spec,
            ),
            compiler_params=cparams,
            input_output_aliases=io_alias,
        )(seed_arr, x_in, pe_in)
    else:
        io_alias = {0: 0} if donate_x else {}
        out = pl.pallas_call(
            pe_add_kernel,
            out_shape=out_shape,
            grid_spec=pltpu.PrefetchScalarGridSpec(
                num_scalar_prefetch=0,
                grid=grid,
                in_specs=[x_spec, pe_spec],
                out_specs=out_spec,
            ),
            compiler_params=cparams,
            input_output_aliases=io_alias,
        )(x_in, pe_in)

    return reshape_out(out)


# ----------------------------------------------------------------------------
# Demo / self-check
# ----------------------------------------------------------------------------
if __name__ == "__main__":
    DROPOUT_P = 0.1
    key = jax.random.PRNGKey(0)

    # --- main shapes: lane-dense d_model -------------------------------------
    B, S, D = 2, 32, 128
    MAX_LEN = 128
    x = jax.random.normal(key, (B, S, D), dtype=jnp.float32)
    pe_table = make_pe_table(D, max_len=MAX_LEN)
    ref = x + pe_table[:, :S, :]

    # eval mode, f32: exact semantics match
    out = jax.block_until_ready(positional_encoding_forward(
        x, pe_table, dropout_p=DROPOUT_P, training=False))
    np.testing.assert_allclose(np.asarray(out), np.asarray(ref),
                               rtol=1e-6, atol=1e-6)

    # eval mode, bf16 (pe cast to bf16 -> halved HBM traffic; documented deviation)
    xb = x.astype(jnp.bfloat16)
    outb = jax.block_until_ready(positional_encoding_forward(
        xb, pe_table, dropout_p=DROPOUT_P, training=False))
    refb = (xb + pe_table[:, :S, :].astype(jnp.bfloat16)).astype(np.float32)
    np.testing.assert_allclose(np.asarray(outb).astype(np.float32),
                               np.asarray(refb), rtol=2e-2, atol=2e-2)

    # training mode: each element is either 0 or (x+pe)/(1-p)
    # NOTE: hash-counter RNG cannot bit-match torch's RNG stream, so we check
    # the inverted-dropout property instead.
    outd = jax.block_until_ready(positional_encoding_forward(
        x, pe_table, dropout_p=DROPOUT_P, training=True, seed=1234))
    y_scaled = np.asarray(ref) / (1.0 - DROPOUT_P)
    od = np.asarray(outd)
    is_zero = np.isclose(od, 0.0, atol=1e-6)
    is_kept = np.isclose(od, y_scaled, rtol=1e-5, atol=1e-6)
    assert bool(np.all(is_zero | is_kept)), "dropout output not in {0, (x+pe)/(1-p)}"
    keep_frac = float((~is_zero).mean())
    assert 0.82 <= keep_frac <= 0.97, f"keep fraction {keep_frac} far from 1-p"

    # folded-batch layout + ragged (masked) seq tail, forced via a small block
    # target so multiple seq tiles exist even at these tiny shapes
    S2 = 72
    x2 = jax.random.normal(jax.random.PRNGKey(1), (B, S2, D), dtype=jnp.float32)
    ref2 = x2 + pe_table[:, :S2, :]
    out2 = jax.block_until_ready(positional_encoding_forward(
        x2, pe_table, dropout_p=DROPOUT_P, training=False,
        target_block_bytes=16 * 1024))
    np.testing.assert_allclose(np.asarray(out2), np.asarray(ref2),
                               rtol=1e-6, atol=1e-6)

    # d_model not a multiple of 128 -> lane-dense flattened layout (eval + dropout)
    B3, S3, D3 = 2, 24, 96
    pe_table3 = make_pe_table(D3, max_len=64)
    x3 = jax.random.normal(jax.random.PRNGKey(2), (B3, S3, D3), dtype=jnp.float32)
    ref3 = x3 + pe_table3[:, :S3, :]
    out3 = jax.block_until_ready(positional_encoding_forward(
        x3, pe_table3, dropout_p=DROPOUT_P, training=False))
    np.testing.assert_allclose(np.asarray(out3), np.asarray(ref3),
                               rtol=1e-6, atol=1e-6)

    outd3 = jax.block_until_ready(positional_encoding_forward(
        x3, pe_table3, dropout_p=DROPOUT_P, training=True, seed=7))
    od3 = np.asarray(outd3)
    y3_scaled = np.asarray(ref3) / (1.0 - DROPOUT_P)
    ok3 = (np.isclose(od3, 0.0, atol=1e-6)
           | np.isclose(od3, y3_scaled, rtol=1e-5, atol=1e-6))
    assert bool(np.all(ok3)), "flat-layout dropout output not in {0, (x+pe)/(1-p)}"

    print("KERNEL_OK")
</pallas_src>

<mosaic_0001>
module attributes {stable_mosaic.version = 11 : i64} {
  func.func @pe_add_kernel(%arg0: i32, %arg1: i32, %arg2: memref<1x32x128xf32, #tpu.memory_space<vmem>>, %arg3: memref<1x32x128xf32, #tpu.memory_space<vmem>>, %arg4: memref<1x32x128xf32, #tpu.memory_space<vmem>>) attributes {dimension_semantics = [#tpu.dimension_semantics<parallel>, #tpu.dimension_semantics<parallel>], iteration_bounds = array<i64: 1, 2>, scalar_prefetch = 0 : i64, scratch_operands = 0 : i64, tpu.core_type = #tpu.core_type<tc>, window_params = [{transform_indices = @transform_0, window_bounds = array<i64: 1, 32, 128>}, {transform_indices = @transform_1, window_bounds = array<i64: 1, 32, 128>}, {transform_indices = @transform_2, window_bounds = array<i64: 1, 32, 128>}]} {
    %c0 = arith.constant 0 : index
    %c0_0 = arith.constant 0 : index
    %c0_1 = arith.constant 0 : index
    %0 = vector.load %arg2[%c0, %c0_0, %c0_1] : memref<1x32x128xf32, #tpu.memory_space<vmem>>, vector<1x32x128xf32>
    %c0_2 = arith.constant 0 : index
    %c0_3 = arith.constant 0 : index
    %c0_4 = arith.constant 0 : index
    %1 = vector.load %arg3[%c0_2, %c0_3, %c0_4] : memref<1x32x128xf32, #tpu.memory_space<vmem>>, vector<1x32x128xf32>
    %2 = arith.addf %0, %1 : vector<1x32x128xf32>
    %c0_5 = arith.constant 0 : index
    %c0_6 = arith.constant 0 : index
    %c0_7 = arith.constant 0 : index
    %3 = vector.load %arg4[%c0_5, %c0_6, %c0_7] : memref<1x32x128xf32, #tpu.memory_space<vmem>>, vector<1x32x128xf32>
    tpu.vector_store %arg4[%c0_5, %c0_6, %c0_7], %2 {strides = array<i32>} : memref<1x32x128xf32, #tpu.memory_space<vmem>>, vector<1x32x128xf32>,
    return
  }
  func.func @transform_0(%arg0: i32, %arg1: i32) -> (i32, i32, i32) {
    %c0_i32 = arith.constant 0 : i32
    %c0_i32_0 = arith.constant 0 : i32
    return %arg1, %arg0, %c0_i32 : i32, i32, i32
  }
  func.func @transform_1(%arg0: i32, %arg1: i32) -> (i32, i32, i32) {
    %c0_i32 = arith.constant 0 : i32
    %c0_i32_0 = arith.constant 0 : i32
    %c0_i32_1 = arith.constant 0 : i32
    return %c0_i32, %arg0, %c0_i32_0 : i32, i32, i32
  }
  func.func @transform_2(%arg0: i32, %arg1: i32) -> (i32, i32, i32) {
    %c0_i32 = arith.constant 0 : i32
    %c0_i32_0 = arith.constant 0 : i32
    return %arg1, %arg0, %c0_i32 : i32, i32, i32
  }
}

</mosaic_0001>

<bundles_post_ra>
// kernel: tpu_custom_call.1
= control target key start
LH: loop header
LB: loop body
LE: loop exit
PB: predicated region body
PF: predicated region fallthrough
CT: control target
= control target key end

     0   :  { %7 = vsyncpa [#allocation3], 0  ;;  %s762_s0 = inlined_call_operand.hbm [shape: f32[2,32,128], index: 0, kind: input, shape index: {}]   ;;  %s763_s1 = inlined_call_operand.hbm [shape: f32[1,32,128], index: 1, kind: input, shape index: {}]   ;;  %s764_s2 = inlined_call_operand.hbm [shape: f32[2,32,128], index: 2, kind: output, shape index: {}]  }
   0x1   :  { %9 = vsyncpa [#allocation3 + $0x1], 0 }
   0x2   :  { %10 = vsyncpa [#allocation6], 0 }
   0x3   :  { %11 = vsyncpa [#allocation4], 0 }
   0x4   :  { %13 = vsyncpa [#allocation4 + $0x1], 0  ;;  %s607_s9 = smov 0   ;;  %s609_s10 = smov 0  }
   0x5   :  { %s611_s11 = smov 0   ;;  %s613_s12 = smov 0  }
   0x6   :  { %s615_s13 = smov 0   ;;  %s617_s14 = smov 0  }
   0x7 LB: > { %s343_s15 = sadd.s32 4294967295, %s585_s14   ;;  %s344_s16 = sadd.s32 4294967294, %s585_s14   ;;  %s585_s14 = sphi %s617_s14, %s19_s14   ;;  %s581_s13 = sphi %s615_s13, %s776_s13   ;;  %s577_s12 = sphi %s613_s12, %s775_s12   ;;  %s573_s11 = sphi %s611_s11, %s774_s11   ;;  %s569_s10 = sphi %s609_s10, %s773_s10   ;;  %s565_s9 = sphi %s607_s9, %s772_s9  }
   0x8   : > { %p53_p0 = scmp.ne.s32.totalorder %s569_s10, %s565_s9  ;;  %p641_p1 = scmp.eq.s32.totalorder %s343_s15, 0 }
   0x9   : > { %p645_p2 = scmp.eq.s32.totalorder %s343_s15, 1  ;;  %p111_p3 = scmp.eq.s32.totalorder %s344_s16, 1 }
   0xa   : > { %p651_p4 = por %p641_p1, %p53_p0  ;;  %p345_p5 = scmp.ge.s32.totalorder %s585_s14, 1 }
   0xb   : > { %p656_p6 = por %p111_p3, %p53_p0  ;;  %p118_p7 = scmp.lt.s32.totalorder %s585_s14, 3 }
   0xc   : > { %s132_s23 = sshll.u32 %s763_s1, 4  ;;  %s587_s25 = smov [#allocation5]   ;;  %s133_s23 = int_to_ptr.hbm [resolvable:$true] %s132_s23 }
   0xd   : > { %p664_p8 = pnand %p345_p5, %p118_p7  ;;  %s134_s26 = sshll.u32 %s587_s25, 4  ;;  %s135_s26 = int_to_ptr.vmem [resolvable:$true] %s134_s26 }
   0xe   : > { %p347_p11 = scmp.ge.s32.totalorder %s585_s14, 2  ;;  %s588_s27 = smov 128  }
   0xf   : > { %p370_p9 = pneg %p664_p8  ;;  %s589_s28 = smov 8  }
  0x10   : > { %s28_s29 = sadd.s32 1, %s581_s13  ;;  %s40_s30 = sadd.s32 1, %s573_s11 }
  0x11   : > { %p371_p10 = pnand %p370_p9, %p641_p1  ;;  %p29_p12 = scmp.ge.s32.totalorder %s28_s29, 2 }
  0x12   : > { %p47_p13 = scmp.ne.s32.totalorder %s573_s11, %s569_s10  ;;  %p48_p0 = scmp.eq.s32.totalorder %s585_s14, 0 }
  0x13   : > { %373 = dma.hbm_to_vmem [thread:$0]  (!%p371_p10), %s133_s23, 512, %s135_s26, [#allocation6], %s588_s27, %s588_s27, %s589_s28  }
  0x14   : > { %s778_s29 = smov (%p29_p12, %s28_s29), 0  ;;  %p683_p3 = por %p48_p0, %p47_p13 }
  0x15   : > { %p689_p5 = por %p645_p2, %p47_p13  ;;  %s35_s5 = ssub.s32 %s581_s13, %s778_s29 }
  0x16   : > { %p383_p7 = scmp.lt.s32.totalorder %s585_s14, 2  ;;  %p38_p9 = scmp.eq.s32.totalorder %s35_s5, 0 }
  0x17   : > { %s148_s6 = sand.u32 1, %s573_s11   ;;  %s360_s15 = sshll.u32 %s581_s13, 5 }
  0x18   : > { %s348_s7 = sshll.u32 %s148_s6, 5  ;;  %s159_s22 = scalar_lea.hbm %s762_s0, %s360_s15 }
  0x19   : > { %s698_s8 = scalar_select %p38_p9, %s573_s11, %s40_s30  }
  0x1a   : > { %s152_s23 = scalar_lea.vmem [#allocation2], %s348_s7  ;;  %s160_s18 = sshll.u32 %s159_s22, 4  ;;  %s161_s18 = int_to_ptr.hbm [resolvable:$true] %s160_s18 }
  0x1b   : > { %s162_s25 = sshll.u32 %s152_s23, 4  ;;  %p375_p2 = pnand %p383_p7, %p683_p3  ;;  %s163_s25 = int_to_ptr.vmem [resolvable:$true] %s162_s25 }
  0x1c   : > { %s149_s26 = scalar_lea.sflag [#allocation3], %s148_s6  ;;  %174 = sbr.rel (%p664_p8) target bundleno = 52 (0x34), region = 28 }
  0x1d   : > { %377 = dma.hbm_to_vmem [thread:$0]  (!%p375_p2), %s161_s18, 512, %s163_s25, %s149_s26, %s588_s27, %s588_s27, %s589_s28  }
  0x1e   : > { %s712_s30 = sand.u32 (!%p664_p8), 1, %s569_s10  }
  0x1f   : > { %s352_s5 = sshll.u32 (!%p664_p8), %s712_s30, 5  ;;  %s177_s7 = scalar_lea.sflag (!%p664_p8), [#allocation3], %s712_s30 }
  0x20   : > { %s180_s15 = scalar_lea.vmem (!%p664_p8), [#allocation2], %s352_s5 }
  0x21   : > { %552 = dma.done.wait (%p651_p4), %s177_s7, 512  }
  0x22   : > { %554 = vsyncadd (%p651_p4), %s177_s7, 4294966784 }
  0x23   : > { %556 = dma.done.wait (%p641_p1), [#allocation6], 512  }
  0x24   : > { %558 = vsyncadd (%p641_p1), [#allocation6], 4294966784  ;;  %s361_s24 = sshll.u32 %s577_s12, 5  ;;  %v210_v0 = vld [vmem:[%s180_s15] sm:$0xff]  ;;  %s206_s6 = scalar_lea.vmem [#allocation7], %s352_s5  ;;  %v211_v2 = vld [vmem:[%s180_s15 + $0x8] sm:$0xff] }
  0x25   : > { %s240_s3 = scalar_lea.hbm %s764_s2, %s361_s24  ;;  %v214_v1 = vld [vmem:[#allocation5] sm:$0xff]  ;;  %s241_s16 = sshll.u32 %s206_s6, 4  ;;  %v215_v4 = vld [vmem:[#allocation5 + $0x8] sm:$0xff]  ;;  %v212_v5 = vld [vmem:[%s180_s15 + $0x10] sm:$0xff]  ;;  %s242_s16 = int_to_ptr.vmem [resolvable:$true] %s241_s16 }
  0x26   : > { %v218_v3 = vadd.f32 %v214_v1, %v210_v0  ;;  %v216_v6 = vld [vmem:[#allocation5 + $0x10] sm:$0xff]  ;;  %s243_s19 = sshll.u32 %s240_s3, 4  ;;  %v219_v7 = vadd.f32 %v215_v4, %v211_v2  ;;  %v213_v9 = vld [vmem:[%s180_s15 + $0x18] sm:$0xff]  ;;  %s227_s12 = scalar_lea.sflag [#allocation4], %s712_s30  ;;  %s244_s19 = int_to_ptr.hbm [resolvable:$true] %s243_s19 }
  0x27   : > { %v220_v8 = vadd.f32 %v216_v6, %v212_v5  ;;  %v217_v10 = vld [vmem:[#allocation5 + $0x18] sm:$0xff]  ;;  %s513_s17 = sshra.s32 %s244_s19, 4  ;;  %s519_s25 = scalar_lea.hbm %s764_s2, 64  ;;  %s514_s17 = int_to_ptr.hbm [resolvable:$true] %s513_s17 }
  0x28   : > { %222 = vst [vmem:[%s206_s6] sm:$0xff] %v218_v3  ;;  %v221_v11 = vadd.f32 %v217_v10, %v213_v9  ;;  %s515_s21 = scalar_lea.hbm %s514_s17, 32  ;;  %p520_p10 = scmp.lt.s32.totalorder %s514_s17, %s764_s2 }
  0x29   : > { %223 = vst [vmem:[%s206_s6 + $0x8] sm:$0xff] %v219_v7  ;;  %p516_p1 = scmp.ne.s32.totalorder %s514_s17, %s515_s21  ;;  %p521_p12 = scmp.lt.s32.totalorder %s519_s25, %s515_s21 }
  0x2a   : > { %224 = vst [vmem:[%s206_s6 + $0x10] sm:$0xff] %v220_v8 }
  0x2b   : > { %225 = vst [vmem:[%s206_s6 + $0x18] sm:$0xff] %v221_v11  ;;  %p517_p4 = pnand %p516_p1, %p689_p5  ;;  %p522_p13 = por %p521_p12, %p520_p10 }
  0x2d   : > { %p518_p8 = pneg %p517_p4 }
  0x2f   : > { %p523_p0 = pnand %p522_p13, %p518_p8 }
  0x31   : > { %526 = shalt.err (!%p523_p0)
}
  0x32   : > { %s590_s30 = smov 128   ;;  %s591_s5 = smov 8  }
  0x33   : > { %368 = dma.vmem_to_hbm [thread:$0]  (%p689_p5), %s242_s16, 512, %s244_s19, %s227_s12, %s590_s30, %s590_s30, %s591_s5  }
  0x34 PF: > { %s258_s7 = sand.u32 1, %s565_s9   ;;  %p379_p3 = pnand %p347_p11, %p656_p6 }
  0x35   : > { %s259_s15 = scalar_lea.sflag [#allocation4], %s258_s7 }
  0x36   : > { %p380_p7 = pneg %p379_p3 }
  0x38   : > { %560 = dma.done.wait (%p380_p7), %s259_s15, 512  }
  0x39   : > { %562 = vsyncadd (%p380_p7), %s259_s15, 4294966784  ;;  %s19_s14 = sadd.s32 1, %s585_s14   ;;  %s772_s9 = smov %s569_s10 }
  0x3a   : > { %p16_p9 = scmp.ge.s32.totalorder %s19_s14, 4   ;;  %s773_s10 = smov %s573_s11 }
  0x3b   : > { %s774_s11 = smov %s698_s8  ;;  %s775_s12 = smov %s581_s13 }
  0x3c   : > { %s776_s13 = smov %s778_s29  ;;  %18 = sbr.rel (!%p16_p9) target bundleno = 7 (0x7), region = 78 }
  0x41   :  { %265 = vsyncpa [#allocation3], 1 }
  0x42   :  { %267 = vsyncpa [#allocation3 + $0x1], 1 }
  0x43   :  { %268 = vsyncpa [#allocation6], 1 }
  0x44   :  { %269 = vsyncpa [#allocation4], 1 }
  0x45   :  { %271 = vsyncpa [#allocation4 + $0x1], 1 }

</bundles_post_ra>
